<compile_context>
chip_gen: v7x
topology: tpu7x:2x2x1
jax: 0.10.0
libtpu: 0.0.40
codegen_flags: <defaults>
</compile_context>

<pallas_src>
import functools

import jax
import jax.numpy as jnp
from jax.experimental import pallas as pl
from jax.experimental.pallas import tpu as pltpu

# YCbCr luma coefficients, identical to the PyTorch buffer:
# torch.tensor([65.738, 129.057, 25.064]).reshape(1,3,1,1) / 256
_GRAY_COEFFS = (65.738 / 256.0, 129.057 / 256.0, 25.064 / 256.0)


def _default_vmem_limit_bytes():
    """Generation-aware scoped-VMEM limit (v7x has only 64 MiB physical)."""
    cap = 64 * 1024 * 1024
    try:
        info = pltpu.get_tpu_info()
        cap = int(getattr(info, "vmem_capacity_bytes", cap))
    except Exception:
        pass
    return max(16 * 1024 * 1024, min(cap // 2, 64 * 1024 * 1024))


def _snap_tile_h(t, H):
    """Round a requested tile height to something BlockSpec-legal:
    a multiple of 8, or the full height H (preferring a multiple of 8 so the
    row fold never needs a padded tail)."""
    t = max(1, min(int(t), H))
    full = H if (H % 8 == 0 or H < 8) else (H // 8) * 8
    if t == H:
        return full
    snapped = max(8, (t // 8) * 8)
    if snapped >= H:
        return full
    return snapped


def _choose_tiling(N, H, W, itemsize, target_slab_bytes, tile_h_override):
    """Pick (tile_h, bn) so each per-input DMA slab is ~target_slab_bytes.

    bn (batch elements per grid step) divides N and is grown only when a whole
    image is smaller than the slab target, to amortize the ~0.35us/step
    pipeline overhead for small images."""
    if tile_h_override is not None:
        tile_h = _snap_tile_h(tile_h_override, H)
    else:
        bytes_per_row = 3 * W * itemsize
        rows = max(8, target_slab_bytes // bytes_per_row)
        tile_h = _snap_tile_h(rows, H)

    bn = 1
    if tile_h == H:
        per_img = 3 * H * W * itemsize
        bn_max = max(1, int(target_slab_bytes // max(per_img, 1)))
        for cand in range(min(bn_max, N), 0, -1):
            if N % cand == 0:
                bn = cand
                break
    return tile_h, bn


def _fold_rows_to_8(x):
    """Sum a (tile_h, W) f32 array down to (8, W) using static sublane-aligned
    slice adds in tree order (VPU only, no reshape copies)."""
    t_h, _w = x.shape
    n_full = t_h // 8
    rem = t_h - n_full * 8
    chunks = [x[i * 8:(i + 1) * 8] for i in range(n_full)]
    if rem:  # only reached when tile_h == H and H < 8 (tiny edge case)
        chunks.append(jnp.pad(x[n_full * 8:], ((0, 8 - rem), (0, 0))))
    while len(chunks) > 1:
        nxt = [chunks[i] + chunks[i + 1] for i in range(0, len(chunks) - 1, 2)]
        if len(chunks) % 2:
            nxt.append(chunks[-1])
        chunks = nxt
    return chunks[0]


def _psnr_partial_kernel(sr_ref, hr_ref, out_ref, *, shave, rgb_range,
                         H, W, tile_h, bn, half_tiles, need_row_mask):
    half = pl.program_id(1)   # parallel split of row tiles (feeds 2nd v7x TC)
    r = pl.program_id(2)      # accumulation axis

    @pl.when(r == 0)
    def _():
        out_ref[...] = jnp.zeros_like(out_ref)

    pixel_range = 255.0 / rgb_range
    # Fold the constant divides into per-channel multipliers:
    #   ((round(clip(s*pr,0,255))/pr) - h) / rgb * coef
    #     == round(clip(s*pr,0,255)) * (coef/(pr*rgb)) - h * (coef/rgb)
    q_mul = tuple(c / (pixel_range * rgb_range) for c in _GRAY_COEFFS)
    h_mul = tuple(c / rgb_range for c in _GRAY_COEFFS)

    # Row validity: cheap (tile_h, 1) compare + broadcast select.  Must be a
    # select (not a multiply) because padded / clamped tiles read garbage that
    # may be NaN/Inf.  Skipped entirely when no shave / padding / clamping.
    row_valid = None
    if need_row_mask:
        tile_idx = half * half_tiles + r       # unclamped global tile index
        grow = (jax.lax.broadcasted_iota(jnp.int32, (tile_h, 1), 0)
                + tile_idx * tile_h)
        row_valid = (grow >= shave) & (grow < H - shave)   # (tile_h, 1)

    # Column shave: single multiply by a (1, W) 0/1 mask (data there is real).
    col_mask = None
    if shave > 0:
        col = jax.lax.broadcasted_iota(jnp.int32, (1, W), 1)
        col_mask = ((col >= shave) & (col < W - shave)).astype(jnp.float32)

    acc = None
    for b in range(bn):
        # channel 0 initializes g directly (no zeros broadcast + add)
        s0 = sr_ref[b, 0].astype(jnp.float32)
        h0 = hr_ref[b, 0].astype(jnp.float32)
        g = (jnp.round(jnp.clip(s0 * pixel_range, 0.0, 255.0)) * q_mul[0]
             - h0 * h_mul[0])
        for c in (1, 2):
            s = sr_ref[b, c].astype(jnp.float32)
            hc = hr_ref[b, c].astype(jnp.float32)
            g = g + (jnp.round(jnp.clip(s * pixel_range, 0.0, 255.0)) * q_mul[c]
                     - hc * h_mul[c])
        sq = g * g
        if row_valid is not None:
            sq = jnp.where(row_valid, sq, 0.0)   # mask BEFORE folding
        if col_mask is not None:
            sq = sq * col_mask
        folded = _fold_rows_to_8(sq)
        acc = folded if acc is None else acc + folded

    out_ref[...] = out_ref[...] + acc[None, None]


def psnr_ycbcr(sr, hr, scale, rgb_range, *, tile_h=None,
               target_slab_bytes=2 * 1024 * 1024, vmem_limit_bytes=None):
    """Pallas equivalent of PSNR_ycbcr.forward(sr, hr, scale, rgb_range).

    `scale` and `rgb_range` are static Python numbers (they drive Python-level
    control flow in the PyTorch code).  Inputs may be float32 or bfloat16; the
    kernel computes in float32."""
    N, C, H, W = sr.shape
    assert C == 3, "PSNR_ycbcr expects 3-channel RGB inputs"
    assert hr.shape == sr.shape

    # PyTorch: when scale == 1 the full diff is used (no shaving applied).
    # TODO(synk): some IPT/EDSR variants shave scale+6 even for scale==1; this
    # matches the exact module given (valid = diff when scale == 1).
    shave = 0 if scale == 1 else int(scale)
    count = N * (H - 2 * shave) * (W - 2 * shave)

    itemsize = jnp.dtype(sr.dtype).itemsize
    tile_h, bn = _choose_tiling(N, H, W, itemsize, target_slab_bytes, tile_h)
    num_row_tiles = pl.cdiv(H, tile_h)
    n_halves = 2 if num_row_tiles >= 2 else 1
    half_tiles = pl.cdiv(num_row_tiles, n_halves)
    num_batch_blocks = N // bn

    rows_padded = (H % tile_h) != 0
    tiles_clamped = (n_halves * half_tiles) != num_row_tiles
    need_row_mask = (shave > 0) or rows_padded or tiles_clamped

    if vmem_limit_bytes is None:
        vmem_limit_bytes = _default_vmem_limit_bytes()

    kernel = functools.partial(
        _psnr_partial_kernel, shave=shave, rgb_range=float(rgb_range),
        H=H, W=W, tile_h=tile_h, bn=bn, half_tiles=half_tiles,
        need_row_mask=need_row_mask)

    def in_map(nb, half, r):
        # clamp so the duplicate tile of an odd split stays in range; the
        # kernel's row mask (computed from the *unclamped* index) zeroes it.
        t = jnp.minimum(half * half_tiles + r, num_row_tiles - 1)
        return (nb, 0, t, 0)

    cost = pl.CostEstimate(
        flops=int(40 * N * 3 * H * W),
        transcendentals=0,
        bytes_accessed=int(2 * N * 3 * H * W * itemsize
                           + num_batch_blocks * n_halves * 8 * W * 4))

    partials = pl.pallas_call(
        kernel,
        out_shape=jax.ShapeDtypeStruct((num_batch_blocks, n_halves, 8, W),
                                       jnp.float32),
        grid_spec=pltpu.PrefetchScalarGridSpec(
            num_scalar_prefetch=0,
            grid=(num_batch_blocks, n_halves, half_tiles),
            in_specs=[
                pl.BlockSpec((bn, C, tile_h, W), in_map),
                pl.BlockSpec((bn, C, tile_h, W), in_map),
            ],
            out_specs=pl.BlockSpec((1, 1, 8, W),
                                   lambda nb, half, r: (nb, half, 0, 0)),
        ),
        compiler_params=pltpu.CompilerParams(
            dimension_semantics=("parallel", "parallel", "arbitrary"),
            vmem_limit_bytes=int(vmem_limit_bytes),
        ),
        cost_estimate=cost,
    )(sr, hr)

    mse = jnp.sum(partials, dtype=jnp.float32) / jnp.float32(count)
    return -10.0 * jnp.log10(mse)


def _psnr_ycbcr_ref(sr, hr, scale, rgb_range):
    """Plain-JAX reference mirroring the PyTorch forward, for verification."""
    pixel_range = 255.0 / rgb_range
    sr_q = jnp.round(jnp.clip(sr * pixel_range, 0.0, 255.0)) / pixel_range
    coeffs = jnp.array(_GRAY_COEFFS, jnp.float32).reshape(1, 3, 1, 1)
    diff = (sr_q.astype(jnp.float32) - hr.astype(jnp.float32)) / rgb_range
    diff = (diff * coeffs).sum(axis=1)
    if scale == 1:
        valid = diff
    else:
        valid = diff[..., scale:-scale, scale:-scale]
    mse = jnp.mean(valid ** 2)
    return -10.0 * jnp.log10(mse)


if __name__ == "__main__":
    key = jax.random.PRNGKey(0)
    rgb_range = 255.0

    def make_pair(k, N, H, W):
        k1, k2 = jax.random.split(k)
        hr = jax.random.uniform(k1, (N, 3, H, W), jnp.float32) * rgb_range
        noise = (jax.random.uniform(k2, (N, 3, H, W), jnp.float32) - 0.5) * 10.0
        sr = jnp.clip(hr + noise, 0.0, rgb_range)
        return sr, hr

    k_a, k_b = jax.random.split(key)
    sr_a, hr_a = make_pair(k_a, 2, 32, 256)   # small images: batch-blocked path
    sr_b, hr_b = make_pair(k_b, 1, 40, 128)   # odd tile count / padded rows

    cases = [
        (sr_a, hr_a, 2, None),  # default tiling: whole image per step, bn=2
        (sr_a, hr_a, 2, 8),     # multi row tile, split across 2 "halves"
        (sr_a, hr_a, 1, 8),     # scale==1: no shaving
        (sr_a, hr_a, 2, 12),    # non-multiple-of-8 override -> snapped to 8
        (sr_b, hr_b, 2, 16),    # odd tile count (clamped dup tile) + padded rows
        (sr_b, hr_b, 2, None),
    ]
    for sr, hr, scale, tile in cases:
        out = jax.block_until_ready(
            psnr_ycbcr(sr, hr, scale, rgb_range, tile_h=tile))
        ref = _psnr_ycbcr_ref(sr, hr, scale, rgb_range)
        assert jnp.isfinite(out), (scale, tile, out)
        assert jnp.allclose(out, ref, rtol=1e-4, atol=1e-3), (scale, tile, out, ref)

    print("KERNEL_OK")
</pallas_src>

<mosaic_0001>
module attributes {stable_mosaic.version = 11 : i64} {
  func.func @_psnr_partial_kernel(%arg0: i32, %arg1: i32, %arg2: i32, %arg3: memref<2x3x32x256xf32, #tpu.memory_space<vmem>>, %arg4: memref<2x3x32x256xf32, #tpu.memory_space<vmem>>, %arg5: memref<1x1x8x256xf32, #tpu.memory_space<vmem>>) attributes {dimension_semantics = [#tpu.dimension_semantics<parallel>, #tpu.dimension_semantics<parallel>, #tpu.dimension_semantics<arbitrary>], iteration_bounds = array<i64: 1, 1, 1>, scalar_prefetch = 0 : i64, scratch_operands = 0 : i64, tpu.core_type = #tpu.core_type<tc>, window_params = [{transform_indices = @transform_0, window_bounds = array<i64: 2, 3, 32, 256>}, {transform_indices = @transform_1, window_bounds = array<i64: 2, 3, 32, 256>}, {transform_indices = @transform_2, window_bounds = array<i64: 1, 1, 8, 256>}]} {
    %c0_i32 = arith.constant 0 : i32
    %0 = arith.cmpi eq, %arg2, %c0_i32 : i32
    %1 = arith.extui %0 : i1 to i32
    %c0_i32_0 = arith.constant 0 : i32
    %2 = arith.cmpi ne, %1, %c0_i32_0 : i32
    scf.if %2 {
      %cst_86 = arith.constant 0.000000e+00 : f32
      %155 = vector.broadcast %cst_86 : f32 to vector<1x1x8x256xf32>
      %c0_87 = arith.constant 0 : index
      %c0_88 = arith.constant 0 : index
      %c0_89 = arith.constant 0 : index
      %c0_90 = arith.constant 0 : index
      %156 = vector.load %arg5[%c0_87, %c0_88, %c0_89, %c0_90] : memref<1x1x8x256xf32, #tpu.memory_space<vmem>>, vector<1x1x8x256xf32>
      tpu.vector_store %arg5[%c0_87, %c0_88, %c0_89, %c0_90], %155 {strides = array<i32>} : memref<1x1x8x256xf32, #tpu.memory_space<vmem>>, vector<1x1x8x256xf32>,
    } else {
    }
    %c1_i32 = arith.constant 1 : i32
    %3 = arith.muli %arg1, %c1_i32 : i32
    %4 = arith.addi %3, %arg2 : i32
    %5 = tpu.iota {dimensions = array<i32: 0>} : vector<32x1xi32>
    %c32_i32 = arith.constant 32 : i32
    %6 = arith.muli %4, %c32_i32 : i32
    %7 = vector.broadcast %6 : i32 to vector<32x1xi32>
    %8 = arith.addi %5, %7 : vector<32x1xi32>
    %c2_i32 = arith.constant 2 : i32
    %9 = vector.broadcast %c2_i32 : i32 to vector<32x1xi32>
    %10 = arith.cmpi sge, %8, %9 : vector<32x1xi32>
    %c30_i32 = arith.constant 30 : i32
    %11 = vector.broadcast %c30_i32 : i32 to vector<32x1xi32>
    %12 = arith.cmpi slt, %8, %11 : vector<32x1xi32>
    %13 = arith.andi %10, %12 : vector<32x1xi1>
    %14 = tpu.iota {dimensions = array<i32: 1>} : vector<1x256xi32>
    %c2_i32_1 = arith.constant 2 : i32
    %15 = vector.broadcast %c2_i32_1 : i32 to vector<1x256xi32>
    %16 = arith.cmpi sge, %14, %15 : vector<1x256xi32>
    %c254_i32 = arith.constant 254 : i32
    %17 = vector.broadcast %c254_i32 : i32 to vector<1x256xi32>
    %18 = arith.cmpi slt, %14, %17 : vector<1x256xi32>
    %19 = arith.andi %16, %18 : vector<1x256xi1>
    %20 = arith.extui %19 : vector<1x256xi1> to vector<1x256xi32>
    %21 = arith.sitofp %20 : vector<1x256xi32> to vector<1x256xf32>
    %c0 = arith.constant 0 : index
    %c0_2 = arith.constant 0 : index
    %c0_3 = arith.constant 0 : index
    %c0_4 = arith.constant 0 : index
    %22 = vector.load %arg3[%c0, %c0_2, %c0_3, %c0_4] : memref<2x3x32x256xf32, #tpu.memory_space<vmem>>, vector<1x1x32x256xf32>
    %23 = vector.shape_cast %22 : vector<1x1x32x256xf32> to vector<32x256xf32>
    %c0_5 = arith.constant 0 : index
    %c0_6 = arith.constant 0 : index
    %c0_7 = arith.constant 0 : index
    %c0_8 = arith.constant 0 : index
    %24 = vector.load %arg4[%c0_5, %c0_6, %c0_7, %c0_8] : memref<2x3x32x256xf32, #tpu.memory_space<vmem>>, vector<1x1x32x256xf32>
    %25 = vector.shape_cast %24 : vector<1x1x32x256xf32> to vector<32x256xf32>
    %cst = arith.constant 1.000000e+00 : f32
    %26 = vector.broadcast %cst : f32 to vector<32x256xf32>
    %27 = arith.mulf %23, %26 : vector<32x256xf32>
    %cst_9 = arith.constant 0.000000e+00 : f32
    %cst_10 = arith.constant 2.550000e+02 : f32
    %28 = vector.broadcast %cst_9 : f32 to vector<32x256xf32>
    %29 = arith.maximumf %28, %27 : vector<32x256xf32>
    %30 = vector.broadcast %cst_10 : f32 to vector<32x256xf32>
    %31 = arith.minimumf %30, %29 : vector<32x256xf32>
    %32 = math.roundeven %31 : vector<32x256xf32>
    %cst_11 = arith.constant 0.00100701593 : f32
    %33 = vector.broadcast %cst_11 : f32 to vector<32x256xf32>
    %34 = arith.mulf %32, %33 : vector<32x256xf32>
    %cst_12 = arith.constant 0.00100701593 : f32
    %35 = vector.broadcast %cst_12 : f32 to vector<32x256xf32>
    %36 = arith.mulf %25, %35 : vector<32x256xf32>
    %37 = arith.subf %34, %36 : vector<32x256xf32>
    %c0_13 = arith.constant 0 : index
    %c1 = arith.constant 1 : index
    %c0_14 = arith.constant 0 : index
    %c0_15 = arith.constant 0 : index
    %38 = vector.load %arg3[%c0_13, %c1, %c0_14, %c0_15] : memref<2x3x32x256xf32, #tpu.memory_space<vmem>>, vector<1x1x32x256xf32>
    %39 = vector.shape_cast %38 : vector<1x1x32x256xf32> to vector<32x256xf32>
    %c0_16 = arith.constant 0 : index
    %c1_17 = arith.constant 1 : index
    %c0_18 = arith.constant 0 : index
    %c0_19 = arith.constant 0 : index
    %40 = vector.load %arg4[%c0_16, %c1_17, %c0_18, %c0_19] : memref<2x3x32x256xf32, #tpu.memory_space<vmem>>, vector<1x1x32x256xf32>
    %41 = vector.shape_cast %40 : vector<1x1x32x256xf32> to vector<32x256xf32>
    %cst_20 = arith.constant 1.000000e+00 : f32
    %42 = vector.broadcast %cst_20 : f32 to vector<32x256xf32>
    %43 = arith.mulf %39, %42 : vector<32x256xf32>
    %cst_21 = arith.constant 0.000000e+00 : f32
    %cst_22 = arith.constant 2.550000e+02 : f32
    %44 = vector.broadcast %cst_21 : f32 to vector<32x256xf32>
    %45 = arith.maximumf %44, %43 : vector<32x256xf32>
    %46 = vector.broadcast %cst_22 : f32 to vector<32x256xf32>
    %47 = arith.minimumf %46, %45 : vector<32x256xf32>
    %48 = math.roundeven %47 : vector<32x256xf32>
    %cst_23 = arith.constant 0.00197697617 : f32
    %49 = vector.broadcast %cst_23 : f32 to vector<32x256xf32>
    %50 = arith.mulf %48, %49 : vector<32x256xf32>
    %cst_24 = arith.constant 0.00197697617 : f32
    %51 = vector.broadcast %cst_24 : f32 to vector<32x256xf32>
    %52 = arith.mulf %41, %51 : vector<32x256xf32>
    %53 = arith.subf %50, %52 : vector<32x256xf32>
    %54 = arith.addf %37, %53 : vector<32x256xf32>
    %c0_25 = arith.constant 0 : index
    %c2 = arith.constant 2 : index
    %c0_26 = arith.constant 0 : index
    %c0_27 = arith.constant 0 : index
    %55 = vector.load %arg3[%c0_25, %c2, %c0_26, %c0_27] : memref<2x3x32x256xf32, #tpu.memory_space<vmem>>, vector<1x1x32x256xf32>
    %56 = vector.shape_cast %55 : vector<1x1x32x256xf32> to vector<32x256xf32>
    %c0_28 = arith.constant 0 : index
    %c2_29 = arith.constant 2 : index
    %c0_30 = arith.constant 0 : index
    %c0_31 = arith.constant 0 : index
    %57 = vector.load %arg4[%c0_28, %c2_29, %c0_30, %c0_31] : memref<2x3x32x256xf32, #tpu.memory_space<vmem>>, vector<1x1x32x256xf32>
    %58 = vector.shape_cast %57 : vector<1x1x32x256xf32> to vector<32x256xf32>
    %cst_32 = arith.constant 1.000000e+00 : f32
    %59 = vector.broadcast %cst_32 : f32 to vector<32x256xf32>
    %60 = arith.mulf %56, %59 : vector<32x256xf32>
    %cst_33 = arith.constant 0.000000e+00 : f32
    %cst_34 = arith.constant 2.550000e+02 : f32
    %61 = vector.broadcast %cst_33 : f32 to vector<32x256xf32>
    %62 = arith.maximumf %61, %60 : vector<32x256xf32>
    %63 = vector.broadcast %cst_34 : f32 to vector<32x256xf32>
    %64 = arith.minimumf %63, %62 : vector<32x256xf32>
    %65 = math.roundeven %64 : vector<32x256xf32>
    %cst_35 = arith.constant 3.83946084E-4 : f32
    %66 = vector.broadcast %cst_35 : f32 to vector<32x256xf32>
    %67 = arith.mulf %65, %66 : vector<32x256xf32>
    %cst_36 = arith.constant 3.83946084E-4 : f32
    %68 = vector.broadcast %cst_36 : f32 to vector<32x256xf32>
    %69 = arith.mulf %58, %68 : vector<32x256xf32>
    %70 = arith.subf %67, %69 : vector<32x256xf32>
    %71 = arith.addf %54, %70 : vector<32x256xf32>
    %72 = arith.mulf %71, %71 : vector<32x256xf32>
    %cst_37 = arith.constant 0.000000e+00 : f32
    %73 = vector.shape_cast %13 : vector<32x1xi1> to vector<32x1xi1>
    %74 = vector.broadcast %73 : vector<32x1xi1> to vector<32x256xi1>
    %75 = vector.broadcast %cst_37 : f32 to vector<32x256xf32>
    %76 = arith.select %74, %72, %75 : vector<32x256xi1>, vector<32x256xf32>
    %77 = vector.broadcast %21 : vector<1x256xf32> to vector<32x256xf32>
    %78 = arith.mulf %76, %77 : vector<32x256xf32>
    %79 = vector.extract_strided_slice %78 {offsets = [0, 0], sizes = [8, 256], strides = [1, 1]} : vector<32x256xf32> to vector<8x256xf32>
    %80 = vector.extract_strided_slice %78 {offsets = [8, 0], sizes = [8, 256], strides = [1, 1]} : vector<32x256xf32> to vector<8x256xf32>
    %81 = vector.extract_strided_slice %78 {offsets = [16, 0], sizes = [8, 256], strides = [1, 1]} : vector<32x256xf32> to vector<8x256xf32>
    %82 = vector.extract_strided_slice %78 {offsets = [24, 0], sizes = [8, 256], strides = [1, 1]} : vector<32x256xf32> to vector<8x256xf32>
    %83 = arith.addf %79, %80 : vector<8x256xf32>
    %84 = arith.addf %81, %82 : vector<8x256xf32>
    %85 = arith.addf %83, %84 : vector<8x256xf32>
    %c1_38 = arith.constant 1 : index
    %c0_39 = arith.constant 0 : index
    %c0_40 = arith.constant 0 : index
    %c0_41 = arith.constant 0 : index
    %86 = vector.load %arg3[%c1_38, %c0_39, %c0_40, %c0_41] : memref<2x3x32x256xf32, #tpu.memory_space<vmem>>, vector<1x1x32x256xf32>
    %87 = vector.shape_cast %86 : vector<1x1x32x256xf32> to vector<32x256xf32>
    %c1_42 = arith.constant 1 : index
    %c0_43 = arith.constant 0 : index
    %c0_44 = arith.constant 0 : index
    %c0_45 = arith.constant 0 : index
    %88 = vector.load %arg4[%c1_42, %c0_43, %c0_44, %c0_45] : memref<2x3x32x256xf32, #tpu.memory_space<vmem>>, vector<1x1x32x256xf32>
    %89 = vector.shape_cast %88 : vector<1x1x32x256xf32> to vector<32x256xf32>
    %cst_46 = arith.constant 1.000000e+00 : f32
    %90 = vector.broadcast %cst_46 : f32 to vector<32x256xf32>
    %91 = arith.mulf %87, %90 : vector<32x256xf32>
    %cst_47 = arith.constant 0.000000e+00 : f32
    %cst_48 = arith.constant 2.550000e+02 : f32
    %92 = vector.broadcast %cst_47 : f32 to vector<32x256xf32>
    %93 = arith.maximumf %92, %91 : vector<32x256xf32>
    %94 = vector.broadcast %cst_48 : f32 to vector<32x256xf32>
    %95 = arith.minimumf %94, %93 : vector<32x256xf32>
    %96 = math.roundeven %95 : vector<32x256xf32>
    %cst_49 = arith.constant 0.00100701593 : f32
    %97 = vector.broadcast %cst_49 : f32 to vector<32x256xf32>
    %98 = arith.mulf %96, %97 : vector<32x256xf32>
    %cst_50 = arith.constant 0.00100701593 : f32
    %99 = vector.broadcast %cst_50 : f32 to vector<32x256xf32>
    %100 = arith.mulf %89, %99 : vector<32x256xf32>
    %101 = arith.subf %98, %100 : vector<32x256xf32>
    %c1_51 = arith.constant 1 : index
    %c1_52 = arith.constant 1 : index
    %c0_53 = arith.constant 0 : index
    %c0_54 = arith.constant 0 : index
    %102 = vector.load %arg3[%c1_51, %c1_52, %c0_53, %c0_54] : memref<2x3x32x256xf32, #tpu.memory_space<vmem>>, vector<1x1x32x256xf32>
    %103 = vector.shape_cast %102 : vector<1x1x32x256xf32> to vector<32x256xf32>
    %c1_55 = arith.constant 1 : index
    %c1_56 = arith.constant 1 : index
    %c0_57 = arith.constant 0 : index
    %c0_58 = arith.constant 0 : index
    %104 = vector.load %arg4[%c1_55, %c1_56, %c0_57, %c0_58] : memref<2x3x32x256xf32, #tpu.memory_space<vmem>>, vector<1x1x32x256xf32>
    %105 = vector.shape_cast %104 : vector<1x1x32x256xf32> to vector<32x256xf32>
    %cst_59 = arith.constant 1.000000e+00 : f32
    %106 = vector.broadcast %cst_59 : f32 to vector<32x256xf32>
    %107 = arith.mulf %103, %106 : vector<32x256xf32>
    %cst_60 = arith.constant 0.000000e+00 : f32
    %cst_61 = arith.constant 2.550000e+02 : f32
    %108 = vector.broadcast %cst_60 : f32 to vector<32x256xf32>
    %109 = arith.maximumf %108, %107 : vector<32x256xf32>
    %110 = vector.broadcast %cst_61 : f32 to vector<32x256xf32>
    %111 = arith.minimumf %110, %109 : vector<32x256xf32>
    %112 = math.roundeven %111 : vector<32x256xf32>
    %cst_62 = arith.constant 0.00197697617 : f32
    %113 = vector.broadcast %cst_62 : f32 to vector<32x256xf32>
    %114 = arith.mulf %112, %113 : vector<32x256xf32>
    %cst_63 = arith.constant 0.00197697617 : f32
    %115 = vector.broadcast %cst_63 : f32 to vector<32x256xf32>
    %116 = arith.mulf %105, %115 : vector<32x256xf32>
    %117 = arith.subf %114, %116 : vector<32x256xf32>
    %118 = arith.addf %101, %117 : vector<32x256xf32>
    %c1_64 = arith.constant 1 : index
    %c2_65 = arith.constant 2 : index
    %c0_66 = arith.constant 0 : index
    %c0_67 = arith.constant 0 : index
    %119 = vector.load %arg3[%c1_64, %c2_65, %c0_66, %c0_67] : memref<2x3x32x256xf32, #tpu.memory_space<vmem>>, vector<1x1x32x256xf32>
    %120 = vector.shape_cast %119 : vector<1x1x32x256xf32> to vector<32x256xf32>
    %c1_68 = arith.constant 1 : index
    %c2_69 = arith.constant 2 : index
    %c0_70 = arith.constant 0 : index
    %c0_71 = arith.constant 0 : index
    %121 = vector.load %arg4[%c1_68, %c2_69, %c0_70, %c0_71] : memref<2x3x32x256xf32, #tpu.memory_space<vmem>>, vector<1x1x32x256xf32>
    %122 = vector.shape_cast %121 : vector<1x1x32x256xf32> to vector<32x256xf32>
    %cst_72 = arith.constant 1.000000e+00 : f32
    %123 = vector.broadcast %cst_72 : f32 to vector<32x256xf32>
    %124 = arith.mulf %120, %123 : vector<32x256xf32>
    %cst_73 = arith.constant 0.000000e+00 : f32
    %cst_74 = arith.constant 2.550000e+02 : f32
    %125 = vector.broadcast %cst_73 : f32 to vector<32x256xf32>
    %126 = arith.maximumf %125, %124 : vector<32x256xf32>
    %127 = vector.broadcast %cst_74 : f32 to vector<32x256xf32>
    %128 = arith.minimumf %127, %126 : vector<32x256xf32>
    %129 = math.roundeven %128 : vector<32x256xf32>
    %cst_75 = arith.constant 3.83946084E-4 : f32
    %130 = vector.broadcast %cst_75 : f32 to vector<32x256xf32>
    %131 = arith.mulf %129, %130 : vector<32x256xf32>
    %cst_76 = arith.constant 3.83946084E-4 : f32
    %132 = vector.broadcast %cst_76 : f32 to vector<32x256xf32>
    %133 = arith.mulf %122, %132 : vector<32x256xf32>
    %134 = arith.subf %131, %133 : vector<32x256xf32>
    %135 = arith.addf %118, %134 : vector<32x256xf32>
    %136 = arith.mulf %135, %135 : vector<32x256xf32>
    %cst_77 = arith.constant 0.000000e+00 : f32
    %137 = vector.shape_cast %13 : vector<32x1xi1> to vector<32x1xi1>
    %138 = vector.broadcast %137 : vector<32x1xi1> to vector<32x256xi1>
    %139 = vector.broadcast %cst_77 : f32 to vector<32x256xf32>
    %140 = arith.select %138, %136, %139 : vector<32x256xi1>, vector<32x256xf32>
    %141 = vector.broadcast %21 : vector<1x256xf32> to vector<32x256xf32>
    %142 = arith.mulf %140, %141 : vector<32x256xf32>
    %143 = vector.extract_strided_slice %142 {offsets = [0, 0], sizes = [8, 256], strides = [1, 1]} : vector<32x256xf32> to vector<8x256xf32>
    %144 = vector.extract_strided_slice %142 {offsets = [8, 0], sizes = [8, 256], strides = [1, 1]} : vector<32x256xf32> to vector<8x256xf32>
    %145 = vector.extract_strided_slice %142 {offsets = [16, 0], sizes = [8, 256], strides = [1, 1]} : vector<32x256xf32> to vector<8x256xf32>
    %146 = vector.extract_strided_slice %142 {offsets = [24, 0], sizes = [8, 256], strides = [1, 1]} : vector<32x256xf32> to vector<8x256xf32>
    %147 = arith.addf %143, %144 : vector<8x256xf32>
    %148 = arith.addf %145, %146 : vector<8x256xf32>
    %149 = arith.addf %147, %148 : vector<8x256xf32>
    %150 = arith.addf %85, %149 : vector<8x256xf32>
    %c0_78 = arith.constant 0 : index
    %c0_79 = arith.constant 0 : index
    %c0_80 = arith.constant 0 : index
    %c0_81 = arith.constant 0 : index
    %151 = vector.load %arg5[%c0_78, %c0_79, %c0_80, %c0_81] : memref<1x1x8x256xf32, #tpu.memory_space<vmem>>, vector<1x1x8x256xf32>
    %152 = vector.shape_cast %150 : vector<8x256xf32> to vector<1x1x8x256xf32>
    %153 = arith.addf %151, %152 : vector<1x1x8x256xf32>
    %c0_82 = arith.constant 0 : index
    %c0_83 = arith.constant 0 : index
    %c0_84 = arith.constant 0 : index
    %c0_85 = arith.constant 0 : index
    %154 = vector.load %arg5[%c0_82, %c0_83, %c0_84, %c0_85] : memref<1x1x8x256xf32, #tpu.memory_space<vmem>>, vector<1x1x8x256xf32>
    tpu.vector_store %arg5[%c0_82, %c0_83, %c0_84, %c0_85], %153 {strides = array<i32>} : memref<1x1x8x256xf32, #tpu.memory_space<vmem>>, vector<1x1x8x256xf32>,
    return
  }
  func.func @transform_0(%arg0: i32, %arg1: i32, %arg2: i32) -> (i32, i32, i32, i32) {
    %c1_i32 = arith.constant 1 : i32
    %0 = arith.muli %arg1, %c1_i32 : i32
    %1 = arith.addi %0, %arg2 : i32
    %c0_i32 = arith.constant 0 : i32
    %2 = arith.minsi %1, %c0_i32 : i32
    %c0_i32_0 = arith.constant 0 : i32
    %c0_i32_1 = arith.constant 0 : i32
    %c0_i32_2 = arith.constant 0 : i32
    return %arg0, %c0_i32_0, %2, %c0_i32_1 : i32, i32, i32, i32
  }
  func.func @transform_1(%arg0: i32, %arg1: i32, %arg2: i32) -> (i32, i32, i32, i32) {
    %c1_i32 = arith.constant 1 : i32
    %0 = arith.muli %arg1, %c1_i32 : i32
    %1 = arith.addi %0, %arg2 : i32
    %c0_i32 = arith.constant 0 : i32
    %2 = arith.minsi %1, %c0_i32 : i32
    %c0_i32_0 = arith.constant 0 : i32
    %c0_i32_1 = arith.constant 0 : i32
    %c0_i32_2 = arith.constant 0 : i32
    return %arg0, %c0_i32_0, %2, %c0_i32_1 : i32, i32, i32, i32
  }
  func.func @transform_2(%arg0: i32, %arg1: i32, %arg2: i32) -> (i32, i32, i32, i32) {
    %c0_i32 = arith.constant 0 : i32
    %c0_i32_0 = arith.constant 0 : i32
    %c0_i32_1 = arith.constant 0 : i32
    return %arg0, %arg1, %c0_i32, %c0_i32_0 : i32, i32, i32, i32
  }
}

</mosaic_0001>

<bundles_post_ra>
// kernel: tpu_custom_call.1
= control target key start
LH: loop header
LB: loop body
LE: loop exit
PB: predicated region body
PF: predicated region fallthrough
CT: control target
= control target key end

     0   :  { %7 = vsyncpa [#allocation3], 0  ;;  %s1039_s0 = inlined_call_operand.hbm [shape: f32[2,3,32,256], index: 0, kind: input, shape index: {}]   ;;  %s1040_s1 = inlined_call_operand.hbm [shape: f32[2,3,32,256], index: 1, kind: input, shape index: {}]   ;;  %s1041_s2 = inlined_call_operand.hbm [shape: f32[1,1,8,256], index: 2, kind: output, shape index: {}]  }
   0x1   :  { %8 = vsyncpa [#allocation6], 0 }
   0x2   :  { %9 = vsyncpa [#allocation4], 0  ;;  %s755_s9 = smov [#allocation2]   ;;  %s683_s13 = scalar_lea.hbm %s1039_s0, 6144 }
   0x3   :  { %s22_s10 = sshll.u32 %s755_s9, 4  ;;  %p684_p0 = scmp.ne.s32.totalorder %s1039_s0, %s683_s13  ;;  %s23_s10 = int_to_ptr.vmem [resolvable:$true] %s22_s10 }
   0x4   :  { %p687_p1 = scmp.lt.u32.totalorder %s683_s13, %s1039_s0 }
   0x6   :  { %p689_p2 = pnand %p687_p1, %p684_p0 }
   0x8   :  { %692 = shalt.err (!%p689_p2)
}
   0x9   :  { %s693_s18 = scalar_lea.vmem %s23_s10, 6144  ;;  %p698_p4 = scmp.lt.s32.totalorder %s23_s10, %s23_s10 }
   0xa   :  { %p694_p3 = scmp.ne.s32.totalorder %s23_s10, %s693_s18  ;;  %p699_p5 = scmp.lt.s32.totalorder %s693_s18, %s693_s18 }
   0xc   :  { %p700_p6 = por %p699_p5, %p698_p4 }
   0xe   :  { %p701_p7 = pnand %p700_p6, %p694_p3 }
  0x10   :  { %704 = shalt.err (!%p701_p7)
}
  0x11   :  { %s756_s19 = smov 256   ;;  %s757_s20 = smov 16  }
  0x12   :  { %28 = dma.hbm_to_vmem [thread:$0]  %s1039_s0, 6144, %s23_s10, [#allocation3], %s756_s19, %s756_s19, %s757_s20  }
  0x13   :  { %s758_s23 = smov [#allocation5]   ;;  %s705_s27 = scalar_lea.hbm %s1040_s1, 6144 }
  0x14   :  { %s41_s24 = sshll.u32 %s758_s23, 4  ;;  %p706_p8 = scmp.ne.s32.totalorder %s1040_s1, %s705_s27  ;;  %s42_s24 = int_to_ptr.vmem [resolvable:$true] %s41_s24 }
  0x15   :  { %p709_p9 = scmp.lt.u32.totalorder %s705_s27, %s1040_s1 }
  0x17   :  { %p711_p10 = pnand %p709_p9, %p706_p8 }
  0x19   :  { %714 = shalt.err (!%p711_p10)
}
  0x1a   :  { %s715_s4 = scalar_lea.vmem %s42_s24, 6144  ;;  %p720_p12 = scmp.lt.s32.totalorder %s42_s24, %s42_s24 }
  0x1b   :  { %p716_p11 = scmp.ne.s32.totalorder %s42_s24, %s715_s4  ;;  %p721_p13 = scmp.lt.s32.totalorder %s715_s4, %s715_s4 }
  0x1d   :  { %p722_p0 = por %p721_p13, %p720_p12 }
  0x1f   :  { %p723_p1 = pnand %p722_p0, %p716_p11 }
  0x21   :  { %726 = shalt.err (!%p723_p1)
}
  0x22   :  { %47 = dma.hbm_to_vmem [thread:$0]  %s1040_s1, 6144, %s42_s24, [#allocation6], %s756_s19, %s756_s19, %s757_s20  }
  0x23   :  { %749 = dma.done.wait [#allocation3], 6144  }
  0x24   :  { %750 = vsyncadd [#allocation3], 4294961152 }
  0x25   :  { %751 = dma.done.wait [#allocation6], 6144  }
  0x26   :  { %752 = vsyncadd [#allocation6], 4294961152  ;;  %v105_v0 = vld [vmem:[#allocation2] sm:$0xff]  ;;  %v106_v1 = vld [vmem:[#allocation2 + $0x8] sm:$0xff]  ;;  %v69_v17 = vlaneseq  ;;  %s760_s1 = smov [#allocation7]  }
  0x27   :  { %v107_v2 = vld [vmem:[#allocation2 + $0x10] sm:$0xff]  ;;  %v108_v3 = vld [vmem:[#allocation2 + $0x18] sm:$0xff]  ;;  %v109_v4 = vld [vmem:[#allocation2 + $0x20] sm:$0xff]  ;;  %v121_v6 = vmax.f32 %v105_v0, 0.0  ;;  %v122_v7 = vmax.f32 %v106_v1, 0.0  ;;  %s613_s6 = sshll.u32 %s760_s1, 4  ;;  %s614_s6 = int_to_ptr.vmem [resolvable:$true] %s613_s6 }
  0x28   :  { %v110_v5 = vld [vmem:[#allocation2 + $0x28] sm:$0xff]  ;;  %v123_v8 = vmax.f32 %v107_v2, 0.0  ;;  %v111_v9 = vld [vmem:[#allocation2 + $0x30] sm:$0xff]  ;;  %v112_v10 = vld [vmem:[#allocation2 + $0x38] sm:$0xff]  ;;  %v124_v11 = vmax.f32 %v108_v3, 0.0  ;;  %v125_v12 = vmax.f32 %v109_v4, 0.0  ;;  %p732_p3 = scmp.lt.s32.totalorder %s614_s6, %s614_s6 }
  0x29   :  { %v126_v13 = vmax.f32 %v110_v5, 0.0  ;;  %v127_v14 = vmax.f32 %v111_v9, 0.0  ;;  %v128_v15 = vmax.f32 %v112_v10, 0.0  ;;  %v129_v16 = vmin.f32 %v121_v6, 255.0  ;;  %v113_v29 = vld [vmem:[#allocation5] sm:$0xff]  ;;  %v114_v30 = vld [vmem:[#allocation5 + $0x8] sm:$0xff] }
  0x2a   :  { %v130_v18 = vmin.f32 %v122_v7, 255.0  ;;  %v131_v19 = vmin.f32 %v123_v8, 255.0  ;;  %v132_v20 = vmin.f32 %v124_v11, 255.0  ;;  %v133_v21 = vmin.f32 %v125_v12, 255.0  ;;  %v115_v37 = vld [vmem:[#allocation5 + $0x10] sm:$0xff]  ;;  %v116_v38 = vld [vmem:[#allocation5 + $0x18] sm:$0xff] }
  0x2b   :  { %v134_v22 = vmin.f32 %v126_v13, 255.0  ;;  %v135_v23 = vmin.f32 %v127_v14, 255.0  ;;  %v136_v24 = vmin.f32 %v128_v15, 255.0  ;;  %v629_v25 = vround.rtne.f32 %v129_v16  ;;  %v117_v39 = vld [vmem:[#allocation5 + $0x20] sm:$0xff]  ;;  %v118_v40 = vld [vmem:[#allocation5 + $0x28] sm:$0xff]  ;;  %v119_v41 = vld [vmem:[#allocation5 + $0x30] sm:$0xff] }
  0x2c   :  { %v630_v26 = vround.rtne.f32 %v130_v18  ;;  %v631_v27 = vround.rtne.f32 %v131_v19  ;;  %v632_v28 = vround.rtne.f32 %v132_v20  ;;  %v633_v31 = vround.rtne.f32 %v133_v21  ;;  %v170_v44 = vld [vmem:[#allocation2 + $0x40] sm:$0xff]  ;;  %v120_v45 = vld [vmem:[#allocation5 + $0x38] sm:$0xff]  ;;  %v171_v49 = vld [vmem:[#allocation2 + $0x48] sm:$0xff]  ;;  %s727_s7 = scalar_lea.vmem %s614_s6, 256 }
  0x2d   :  { %v634_v32 = vround.rtne.f32 %v134_v22  ;;  %v635_v33 = vround.rtne.f32 %v135_v23  ;;  %v636_v34 = vround.rtne.f32 %v136_v24  ;;  %v800_v35 = vshrl.u32 %v69_v17, 7  ;;  %v172_v50 = vld [vmem:[#allocation2 + $0x50] sm:$0xff]  ;;  %v173_v51 = vld [vmem:[#allocation2 + $0x58] sm:$0xff]  ;;  %v174_v55 = vld [vmem:[#allocation2 + $0x60] sm:$0xff]  ;;  %p728_p2 = scmp.ne.s32.totalorder %s614_s6, %s727_s7  ;;  %p733_p4 = scmp.lt.s32.totalorder %s727_s7, %s727_s7 }
  0x2e   :  { %v802_v36 = vand.u32 127, %v69_v17  ;;  %v804_v42 = vmul.f32 0.0010070159, %v629_v25  ;;  %v806_v43 = vmul.f32 0.0010070159, %v630_v26  ;;  %v175_v56 = vld [vmem:[#allocation2 + $0x68] sm:$0xff] }
  0x2f   :  { %v808_v46 = vmul.f32 0.0010070159, %v631_v27  ;;  %v810_v47 = vmul.f32 0.0010070159, %v632_v28  ;;  %v812_v48 = vmul.f32 0.0010070159, %v633_v31  ;;  %p734_p5 = por %p733_p4, %p732_p3 }
  0x30   :  { %v814_v52 = vmul.f32 0.0010070159, %v634_v32  ;;  %v816_v53 = vmul.f32 0.0010070159, %v635_v33  ;;  %v818_v54 = vmul.f32 0.0010070159, %v636_v34 }
  0x31   :  { %v820_v57 = vmul.f32 0.0010070159, %v113_v29  ;;  %v822_v58 = vmul.f32 0.0010070159, %v114_v30  ;;  %v824_v59 = vmul.f32 0.0010070159, %v115_v37  ;;  %p735_p6 = pnand %p734_p5, %p728_p2 }
  0x32   :  { %v826_v60 = vmul.f32 0.0010070159, %v116_v38  ;;  %v828_v61 = vmul.f32 0.0010070159, %v117_v39  ;;  %v176_v62 = vld [vmem:[#allocation2 + $0x70] sm:$0xff]  ;;  %v177_v63 = vld [vmem:[#allocation2 + $0x78] sm:$0xff] }
  0x33   :  { %v831_v0 = vadd.s32 128, %v802_v36  ;;  %v833_v1 = vmul.f32 0.0010070159, %v118_v40  ;;  %v835_v2 = vmul.f32 0.0010070159, %v119_v41  ;;  %v187_v3 = vmax.f32 %v170_v44, 0.0 }
  0x34   :  { %v837_v4 = vmul.f32 0.0010070159, %v120_v45  ;;  %v188_v5 = vmax.f32 %v171_v49, 0.0  ;;  %v189_v6 = vmax.f32 %v172_v50, 0.0  ;;  %v190_v7 = vmax.f32 %v173_v51, 0.0  ;;  %v179_v16 = vld [vmem:[#allocation5 + $0x40] sm:$0xff] }
  0x35   :  { %v191_v8 = vmax.f32 %v174_v55, 0.0  ;;  %v192_v9 = vmax.f32 %v175_v56, 0.0  ;;  %v193_v10 = vmax.f32 %v176_v62, 0.0  ;;  %v194_v11 = vmax.f32 %v177_v63, 0.0  ;;  %v180_v21 = vld [vmem:[#allocation5 + $0x48] sm:$0xff]  ;;  %v181_v22 = vld [vmem:[#allocation5 + $0x50] sm:$0xff] }
  0x36   :  { %v195_v12 = vmin.f32 %v187_v3, 255.0  ;;  %v196_v13 = vmin.f32 %v188_v5, 255.0  ;;  %v197_v14 = vmin.f32 %v189_v6, 255.0  ;;  %v198_v15 = vmin.f32 %v190_v7, 255.0  ;;  %v182_v23 = vld [vmem:[#allocation5 + $0x58] sm:$0xff]  ;;  %v183_v28 = vld [vmem:[#allocation5 + $0x60] sm:$0xff] }
  0x37   :  { %v199_v17 = vmin.f32 %v191_v8, 255.0  ;;  %v200_v18 = vmin.f32 %v192_v9, 255.0  ;;  %v201_v19 = vmin.f32 %v193_v10, 255.0  ;;  %v202_v20 = vmin.f32 %v194_v11, 255.0  ;;  %v184_v29 = vld [vmem:[#allocation5 + $0x68] sm:$0xff]  ;;  %v185_v30 = vld [vmem:[#allocation5 + $0x70] sm:$0xff] }
  0x38   :  { %v637_v24 = vround.rtne.f32 %v195_v12  ;;  %v638_v25 = vround.rtne.f32 %v196_v13  ;;  %v639_v26 = vround.rtne.f32 %v197_v14  ;;  %v640_v27 = vround.rtne.f32 %v198_v15  ;;  %v186_v38 = vld [vmem:[#allocation5 + $0x78] sm:$0xff]  ;;  %v244_v9 = vld [vmem:[#allocation2 + $0x80] sm:$0xff]  ;;  %v245_v10 = vld [vmem:[#allocation2 + $0x88] sm:$0xff] }
  0x39   :  { %v641_v31 = vround.rtne.f32 %v199_v17  ;;  %v642_v32 = vround.rtne.f32 %v200_v18  ;;  %v643_v33 = vround.rtne.f32 %v201_v19  ;;  %v644_v34 = vround.rtne.f32 %v202_v20  ;;  %v246_v13 = vld [vmem:[#allocation2 + $0x90] sm:$0xff]  ;;  %v247_v14 = vld [vmem:[#allocation2 + $0x98] sm:$0xff]  ;;  %v248_v15 = vld [vmem:[#allocation2 + $0xa0] sm:$0xff] }
  0x3a   :  { %v161_v37 = vsub.f32 %v804_v42, %v820_v57  ;;  %v211_v39 = vmul.f32 0.0019769762, %v637_v24  ;;  %v212_v40 = vmul.f32 0.0019769762, %v638_v25  ;;  %v213_v41 = vmul.f32 0.0019769762, %v639_v26 }
  0x3b   :  { %v162_v44 = vsub.f32 %v806_v43, %v822_v58  ;;  %v214_v45 = vmul.f32 0.0019769762, %v640_v27  ;;  %v843_v49 = vmul.f32 0.0019769762, %v641_v31  ;;  %v845_v50 = vmul.f32 0.0019769762, %v642_v32 }
  0x3c   :  { %v163_v51 = vsub.f32 %v808_v46, %v824_v59  ;;  %v849_v55 = vmul.f32 0.0019769762, %v643_v33  ;;  %v851_v56 = vmul.f32 0.0019769762, %v644_v34  ;;  %v219_v42 = vmul.f32 0.0019769762, %v179_v16 }
  0x3d   :  { %v164_v57 = vsub.f32 %v810_v47, %v826_v60  ;;  %v220_v62 = vmul.f32 0.0019769762, %v180_v21  ;;  %v221_v63 = vmul.f32 0.0019769762, %v181_v22  ;;  %v222_v3 = vmul.f32 0.0019769762, %v182_v23 }
  0x3e   :  { %v223_v43 = vmul.f32 0.0019769762, %v183_v28  ;;  %v855_v58 = vmul.f32 0.0019769762, %v184_v29  ;;  %v857_v5 = vmul.f32 0.0019769762, %v185_v30  ;;  %v227_v6 = vsub.f32 %v211_v39, %v219_v42 }
  0x3f   :  { %v859_v7 = vmul.f32 0.0019769762, %v186_v38  ;;  %v228_v46 = vsub.f32 %v212_v40, %v220_v62  ;;  %v229_v59 = vsub.f32 %v213_v41, %v221_v63  ;;  %v230_v8 = vsub.f32 %v214_v45, %v222_v3  ;;  %v251_v18 = vld [vmem:[#allocation2 + $0xb8] sm:$0xff]  ;;  %v253_v31 = vld [vmem:[#allocation5 + $0x80] sm:$0xff]  ;;  %v254_v38 = vld [vmem:[#allocation5 + $0x88] sm:$0xff] }
  0x40   :  { %v165_v11 = vsub.f32 %v812_v48, %v828_v61  ;;  %v166_v47 = vsub.f32 %v814_v52, %v833_v1  ;;  %v167_v60 = vsub.f32 %v816_v53, %v835_v2  ;;  %v168_v12 = vsub.f32 %v818_v54, %v837_v4  ;;  %v249_v52 = vld [vmem:[#allocation2 + $0xa8] sm:$0xff]  ;;  %v250_v1 = vld [vmem:[#allocation2 + $0xb0] sm:$0xff]  ;;  %v256_v40 = vld [vmem:[#allocation5 + $0x98] sm:$0xff] }
  0x41   :  { %v231_v16 = vsub.f32 %v843_v49, %v223_v43  ;;  %v232_v17 = vsub.f32 %v845_v50, %v855_v58  ;;  %v233_v48 = vsub.f32 %v849_v55, %v857_v5  ;;  %v874_v61 = vadd.f32 %v227_v6, %v161_v37  ;;  %v255_v39 = vld [vmem:[#allocation5 + $0x90] sm:$0xff]  ;;  %v257_v50 = vld [vmem:[#allocation5 + $0xa0] sm:$0xff]  ;;  %v260_v3 = vld [vmem:[#allocation5 + $0xb8] sm:$0xff] }
  0x42   :  { %v234_v53 = vsub.f32 %v851_v56, %v859_v7  ;;  %v878_v54 = vadd.f32 %v228_v46, %v162_v44  ;;  %v880_v2 = vadd.f32 %v229_v59, %v163_v51  ;;  %v261_v4 = vmax.f32 %v244_v9, 0.0  ;;  %v258_v51 = vld [vmem:[#allocation5 + $0xa8] sm:$0xff]  ;;  %v259_v55 = vld [vmem:[#allocation5 + $0xb0] sm:$0xff] }
  0x43   :  { %v882_v19 = vadd.f32 %v230_v8, %v164_v57  ;;  %v262_v20 = vmax.f32 %v245_v10, 0.0  ;;  %v263_v21 = vmax.f32 %v246_v13, 0.0  ;;  %v264_v22 = vmax.f32 %v247_v14, 0.0 }
  0x44   :  { %v265_v23 = vmax.f32 %v248_v15, 0.0  ;;  %v266_v24 = vmax.f32 %v249_v52, 0.0  ;;  %v267_v25 = vmax.f32 %v250_v1, 0.0  ;;  %v268_v26 = vmax.f32 %v251_v18, 0.0 }
  0x45   :  { %v269_v27 = vmin.f32 %v261_v4, 255.0  ;;  %v270_v28 = vmin.f32 %v262_v20, 255.0  ;;  %v271_v29 = vmin.f32 %v263_v21, 255.0  ;;  %v272_v30 = vmin.f32 %v264_v22, 255.0 }
  0x46   :  { %v273_v32 = vmin.f32 %v265_v23, 255.0  ;;  %v274_v33 = vmin.f32 %v266_v24, 255.0  ;;  %v275_v34 = vmin.f32 %v267_v25, 255.0  ;;  %v276_v37 = vmin.f32 %v268_v26, 255.0 }
  0x47   :  { %v645_v41 = vround.rtne.f32 %v269_v27  ;;  %v646_v44 = vround.rtne.f32 %v270_v28  ;;  %v647_v45 = vround.rtne.f32 %v271_v29  ;;  %v648_v49 = vround.rtne.f32 %v272_v30 }
  0x48   :  { %v649_v56 = vround.rtne.f32 %v273_v32  ;;  %v650_v42 = vround.rtne.f32 %v274_v33  ;;  %v651_v57 = vround.rtne.f32 %v275_v34  ;;  %v652_v62 = vround.rtne.f32 %v276_v37  ;;  %v356_v34 = vld [vmem:[#allocation2 + $0xc0] sm:$0xff]  ;;  %v357_v37 = vld [vmem:[#allocation2 + $0xc8] sm:$0xff] }
  0x49   :  { %v239_v63 = vadd.f32 %v231_v16, %v165_v11  ;;  %v285_v43 = vmul.f32 0.00038394608, %v645_v41  ;;  %v286_v58 = vmul.f32 0.00038394608, %v646_v44  ;;  %v287_v5 = vmul.f32 0.00038394608, %v647_v45 }
  0x4a   :  { %v240_v6 = vadd.f32 %v232_v17, %v166_v47  ;;  %v288_v7 = vmul.f32 0.00038394608, %v648_v49  ;;  %v289_v46 = vmul.f32 0.00038394608, %v649_v56  ;;  %v290_v59 = vmul.f32 0.00038394608, %v650_v42 }
  0x4b   :  { %v241_v8 = vadd.f32 %v233_v48, %v167_v60  ;;  %v291_v9 = vmul.f32 0.00038394608, %v651_v57  ;;  %v292_v10 = vmul.f32 0.00038394608, %v652_v62  ;;  %v293_v13 = vmul.f32 0.00038394608, %v253_v31 }
  0x4c   :  { %v242_v14 = vadd.f32 %v234_v53, %v168_v12  ;;  %v294_v15 = vmul.f32 0.00038394608, %v254_v38  ;;  %v295_v52 = vmul.f32 0.00038394608, %v255_v39  ;;  %v296_v1 = vmul.f32 0.00038394608, %v256_v40 }
  0x4d   :  { %v297_v18 = vmul.f32 0.00038394608, %v257_v50  ;;  %v298_v4 = vmul.f32 0.00038394608, %v258_v51  ;;  %v299_v20 = vmul.f32 0.00038394608, %v259_v55  ;;  %v301_v11 = vsub.f32 %v285_v43, %v293_v13 }
  0x4e   :  { %v300_v16 = vmul.f32 0.00038394608, %v260_v3  ;;  %v302_v21 = vsub.f32 %v286_v58, %v294_v15  ;;  %v303_v22 = vsub.f32 %v287_v5, %v295_v52  ;;  %v304_v23 = vsub.f32 %v288_v7, %v296_v1  ;;  %v360_v38 = vld [vmem:[#allocation2 + $0xe0] sm:$0xff]  ;;  %v361_v45 = vld [vmem:[#allocation2 + $0xe8] sm:$0xff]  ;;  %v362_v49 = vld [vmem:[#allocation2 + $0xf0] sm:$0xff] }
  0x4f   :  { %v305_v47 = vsub.f32 %v289_v46, %v297_v18  ;;  %v306_v17 = vsub.f32 %v290_v59, %v298_v4  ;;  %v307_v24 = vsub.f32 %v291_v9, %v299_v20  ;;  %v309_v60 = vadd.f32 %v301_v11, %v874_v61  ;;  %v363_v50 = vld [vmem:[#allocation2 + $0xf8] sm:$0xff] }
  0x50   :  { %v886_v48 = vadd.s32 24, %v800_v35  ;;  %vm80_vm0 = vcmp.ge.s32.totalorder %v800_v35, 2  ;;  %v308_v12 = vsub.f32 %v292_v10, %v300_v16  ;;  %v310_v53 = vadd.f32 %v302_v21, %v878_v54 }
  0x51   :  { %vm95_vm1 = vcmp.ge.s32.totalorder %v802_v36, 2  ;;  %vm98_vm2 = vcmp.lt.s32.totalorder %v831_v0, 254  ;;  %v311_v25 = vadd.f32 %v303_v22, %v880_v2  ;;  %v317_v26 = vmul.f32 %v309_v60, %v309_v60  ;;  %v358_v2 = vld [vmem:[#allocation2 + $0xd0] sm:$0xff]  ;;  %v365_v22 = vld [vmem:[#allocation5 + $0xc0] sm:$0xff] }
  0x52   :  { %v312_v27 = vadd.f32 %v304_v23, %v882_v19  ;;  %v313_v28 = vadd.f32 %v305_v47, %v239_v63  ;;  %v314_v29 = vadd.f32 %v306_v17, %v240_v6  ;;  %v315_v61 = vadd.f32 %v307_v24, %v241_v8  ;;  %v359_v19 = vld [vmem:[#allocation2 + $0xd8] sm:$0xff]  ;;  %v366_v23 = vld [vmem:[#allocation5 + $0xc8] sm:$0xff]  ;;  %v367_v47 = vld [vmem:[#allocation5 + $0xd0] sm:$0xff] }
  0x53   :  { %v316_v30 = vadd.f32 %v308_v12, %v242_v14  ;;  %v318_v31 = vmul.f32 %v310_v53, %v310_v53  ;;  %v759_v32 = vmov 0.0   ;;  %vm87_vm3 = vcmp.lt.s32.totalorder %v886_v48, 30 }
  0x54   :  { %v894_v33 = vsel %vm95_vm1, 1.0, %v759_v32  ;;  %v897_v36 = vsel %vm98_vm2, 1.0, %v759_v32  ;;  %v319_v0 = vmul.f32 %v311_v25, %v311_v25  ;;  %v333_v54 = vsel %vm80_vm0, %v317_v26, 0.0  ;;  %v368_v25 = vld [vmem:[#allocation5 + $0xd8] sm:$0xff]  ;;  %v369_v26 = vld [vmem:[#allocation5 + $0xe0] sm:$0xff] }
  0x55   :  { %v320_v39 = vmul.f32 %v312_v27, %v312_v27  ;;  %v321_v40 = vmul.f32 %v313_v28, %v313_v28  ;;  %v322_v41 = vmul.f32 %v314_v29, %v314_v29  ;;  %v323_v44 = vmul.f32 %v315_v61, %v315_v61  ;;  %v370_v27 = vld [vmem:[#allocation5 + $0xe8] sm:$0xff]  ;;  %v371_v61 = vld [vmem:[#allocation5 + $0xf0] sm:$0xff] }
  0x56   :  { %v324_v51 = vmul.f32 %v316_v30, %v316_v30  ;;  %v334_v55 = vsel %vm80_vm0, %v318_v31, 0.0  ;;  %v373_v56 = vmax.f32 %v356_v34, 0.0  ;;  %v374_v42 = vmax.f32 %v357_v37, 0.0  ;;  %v372_v30 = vld [vmem:[#allocation5 + $0xf8] sm:$0xff]  ;;  %v422_v34 = vld [vmem:[#allocation2 + $0x100] sm:$0xff]  ;;  %v423_v37 = vld [vmem:[#allocation2 + $0x108] sm:$0xff] }
  0x57   :  { %v341_v57 = vmul.f32 %v894_v33, %v333_v54  ;;  %v375_v62 = vmax.f32 %v358_v2, 0.0  ;;  %v376_v63 = vmax.f32 %v359_v19, 0.0  ;;  %v377_v3 = vmax.f32 %v360_v38, 0.0  ;;  %v424_v38 = vld [vmem:[#allocation2 + $0x110] sm:$0xff] }
  0x58   :  { %v343_v43 = vmul.f32 %v894_v33, %v319_v0  ;;  %v378_v58 = vmax.f32 %v361_v45, 0.0  ;;  %v379_v5 = vmax.f32 %v362_v49, 0.0  ;;  %v380_v6 = vmax.f32 %v363_v50, 0.0 }
  0x59   :  { %v339_v7 = vsel %vm87_vm3, %v323_v44, 0.0  ;;  %v381_v46 = vmin.f32 %v373_v56, 255.0  ;;  %v382_v59 = vmin.f32 %v374_v42, 255.0  ;;  %v383_v8 = vmin.f32 %v375_v62, 255.0 }
  0x5a   :  { %v342_v9 = vmul.f32 %v897_v36, %v334_v55  ;;  %v384_v10 = vmin.f32 %v376_v63, 255.0  ;;  %v385_v13 = vmin.f32 %v377_v3, 255.0  ;;  %v386_v14 = vmin.f32 %v378_v58, 255.0  ;;  %v429_v55 = vld [vmem:[#allocation2 + $0x138] sm:$0xff] }
  0x5b   :  { %v387_v15 = vmin.f32 %v379_v5, 255.0  ;;  %v388_v52 = vmin.f32 %v380_v6, 255.0  ;;  %v653_v1 = vround.rtne.f32 %v381_v46  ;;  %v654_v18 = vround.rtne.f32 %v382_v59 }
  0x5c   :  { %v340_v4 = vsel %vm87_vm3, %v324_v51, 0.0  ;;  %v655_v20 = vround.rtne.f32 %v383_v8  ;;  %v656_v11 = vround.rtne.f32 %v384_v10  ;;  %v657_v16 = vround.rtne.f32 %v385_v13  ;;  %v428_v51 = vld [vmem:[#allocation2 + $0x130] sm:$0xff] }
  0x5d   :  { %v344_v21 = vmul.f32 %v897_v36, %v320_v39  ;;  %v658_v17 = vround.rtne.f32 %v386_v14  ;;  %v659_v24 = vround.rtne.f32 %v387_v15  ;;  %v660_v60 = vround.rtne.f32 %v388_v52  ;;  %v425_v39 = vld [vmem:[#allocation2 + $0x118] sm:$0xff] }
  0x5e   :  { %v345_v12 = vmul.f32 %v894_v33, %v321_v40  ;;  %v347_v53 = vmul.f32 %v894_v33, %v339_v7  ;;  %v346_v28 = vmul.f32 %v897_v36, %v322_v41  ;;  %v348_v29 = vmul.f32 %v897_v36, %v340_v4  ;;  %v426_v40 = vld [vmem:[#allocation2 + $0x120] sm:$0xff]  ;;  %v427_v41 = vld [vmem:[#allocation2 + $0x128] sm:$0xff] }
  0x5f   :  { %v915_v31 = vmul.f32 0.0010070159, %v653_v1  ;;  %v917_v32 = vmul.f32 0.0010070159, %v654_v18  ;;  %v919_v0 = vadd.f32 %v343_v43, %v341_v57  ;;  %v921_v54 = vmul.f32 0.0010070159, %v655_v20 }
  0x60   :  { %v923_v2 = vmul.f32 0.0010070159, %v656_v11  ;;  %v925_v19 = vmul.f32 0.0010070159, %v657_v16  ;;  %v927_v44 = vadd.f32 %v344_v21, %v342_v9  ;;  %v929_v45 = vmul.f32 0.0010070159, %v658_v17 }
  0x61   :  { %v931_v49 = vmul.f32 0.0010070159, %v659_v24  ;;  %v933_v50 = vmul.f32 0.0010070159, %v660_v60  ;;  %v935_v56 = vadd.f32 %v347_v53, %v345_v12  ;;  %v937_v42 = vmul.f32 0.0010070159, %v365_v22 }
  0x62   :  { %v939_v57 = vmul.f32 0.0010070159, %v366_v23  ;;  %v941_v62 = vmul.f32 0.0010070159, %v367_v47  ;;  %v943_v63 = vadd.f32 %v348_v29, %v346_v28  ;;  %v945_v3 = vmul.f32 0.0010070159, %v368_v25 }
  0x63   :  { %v947_v43 = vmul.f32 0.0010070159, %v369_v26  ;;  %v949_v58 = vmul.f32 0.0010070159, %v370_v27  ;;  %v951_v5 = vmul.f32 0.0010070159, %v371_v61 }
  0x64   :  { %v953_v6 = vmul.f32 0.0010070159, %v372_v30  ;;  %v439_v7 = vmax.f32 %v422_v34, 0.0  ;;  %v440_v46 = vmax.f32 %v423_v37, 0.0  ;;  %v441_v59 = vmax.f32 %v424_v38, 0.0  ;;  %v431_v11 = vld [vmem:[#allocation5 + $0x100] sm:$0xff] }
  0x65   :  { %v442_v8 = vmax.f32 %v425_v39, 0.0  ;;  %v443_v9 = vmax.f32 %v426_v40, 0.0  ;;  %v444_v10 = vmax.f32 %v427_v41, 0.0  ;;  %v445_v13 = vmax.f32 %v428_v51, 0.0  ;;  %v432_v16 = vld [vmem:[#allocation5 + $0x108] sm:$0xff]  ;;  %v433_v21 = vld [vmem:[#allocation5 + $0x110] sm:$0xff] }
  0x66   :  { %v446_v14 = vmax.f32 %v429_v55, 0.0  ;;  %v447_v15 = vmin.f32 %v439_v7, 255.0  ;;  %v448_v52 = vmin.f32 %v440_v46, 255.0  ;;  %v449_v1 = vmin.f32 %v441_v59, 255.0  ;;  %v434_v24 = vld [vmem:[#allocation5 + $0x118] sm:$0xff]  ;;  %v435_v60 = vld [vmem:[#allocation5 + $0x120] sm:$0xff] }
  0x67   :  { %v450_v18 = vmin.f32 %v442_v8, 255.0  ;;  %v451_v4 = vmin.f32 %v443_v9, 255.0  ;;  %v452_v20 = vmin.f32 %v444_v10, 255.0  ;;  %v453_v22 = vmin.f32 %v445_v13, 255.0  ;;  %v436_v12 = vld [vmem:[#allocation5 + $0x128] sm:$0xff]  ;;  %v437_v28 = vld [vmem:[#allocation5 + $0x130] sm:$0xff] }
  0x68   :  { %v454_v23 = vmin.f32 %v446_v14, 255.0  ;;  %v661_v47 = vround.rtne.f32 %v447_v15  ;;  %v662_v17 = vround.rtne.f32 %v448_v52  ;;  %v663_v53 = vround.rtne.f32 %v449_v1  ;;  %v438_v29 = vld [vmem:[#allocation5 + $0x138] sm:$0xff] }
  0x69   :  { %v664_v25 = vround.rtne.f32 %v450_v18  ;;  %v665_v26 = vround.rtne.f32 %v451_v4  ;;  %v666_v27 = vround.rtne.f32 %v452_v20  ;;  %v667_v61 = vround.rtne.f32 %v453_v22  ;;  %v498_v4 = vld [vmem:[#allocation2 + $0x150] sm:$0xff] }
  0x6a   :  { %v668_v30 = vround.rtne.f32 %v454_v23  ;;  %v463_v34 = vmul.f32 0.0019769762, %v661_v47  ;;  %v464_v37 = vmul.f32 0.0019769762, %v662_v17  ;;  %v413_v38 = vsub.f32 %v915_v31, %v937_v42 }
  0x6b   :  { %v465_v39 = vmul.f32 0.0019769762, %v663_v53  ;;  %v466_v40 = vmul.f32 0.0019769762, %v664_v25  ;;  %v957_v41 = vmul.f32 0.0019769762, %v665_v26  ;;  %v414_v51 = vsub.f32 %v917_v32, %v939_v57 }
  0x6c   :  { %v961_v55 = vmul.f32 0.0019769762, %v666_v27  ;;  %v963_v7 = vmul.f32 0.0019769762, %v667_v61  ;;  %v965_v46 = vmul.f32 0.0019769762, %v668_v30  ;;  %v415_v59 = vsub.f32 %v921_v54, %v941_v62 }
  0x6d   :  { %v471_v8 = vmul.f32 0.0019769762, %v431_v11  ;;  %v472_v9 = vmul.f32 0.0019769762, %v432_v16  ;;  %v473_v10 = vmul.f32 0.0019769762, %v433_v21  ;;  %v416_v31 = vsub.f32 %v923_v2, %v945_v3 }
  0x6e   :  { %v474_v42 = vmul.f32 0.0019769762, %v434_v24  ;;  %v971_v13 = vmul.f32 0.0019769762, %v435_v60  ;;  %v973_v14 = vmul.f32 0.0019769762, %v436_v12  ;;  %v417_v54 = vsub.f32 %v925_v19, %v947_v43 }
  0x6f   :  { %v975_v32 = vmul.f32 0.0019769762, %v437_v28  ;;  %v977_v57 = vmul.f32 0.0019769762, %v438_v29  ;;  %v479_v15 = vsub.f32 %v463_v34, %v471_v8  ;;  %v480_v52 = vsub.f32 %v464_v37, %v472_v9  ;;  %v496_v2 = vld [vmem:[#allocation2 + $0x140] sm:$0xff]  ;;  %v497_v3 = vld [vmem:[#allocation2 + $0x148] sm:$0xff] }
  0x70   :  { %v418_v62 = vsub.f32 %v929_v45, %v949_v58  ;;  %v481_v1 = vsub.f32 %v465_v39, %v473_v10  ;;  %v482_v18 = vsub.f32 %v466_v40, %v474_v42  ;;  %v419_v20 = vsub.f32 %v931_v49, %v951_v5  ;;  %v499_v43 = vld [vmem:[#allocation2 + $0x158] sm:$0xff]  ;;  %v500_v21 = vld [vmem:[#allocation2 + $0x160] sm:$0xff]  ;;  %v501_v45 = vld [vmem:[#allocation2 + $0x168] sm:$0xff] }
  0x71   :  { %v420_v11 = vsub.f32 %v933_v50, %v953_v6  ;;  %v483_v16 = vsub.f32 %v957_v41, %v971_v13  ;;  %v484_v19 = vsub.f32 %v961_v55, %v973_v14  ;;  %v485_v58 = vsub.f32 %v963_v7, %v975_v32  ;;  %v502_v50 = vld [vmem:[#allocation2 + $0x170] sm:$0xff]  ;;  %v503_v5 = vld [vmem:[#allocation2 + $0x178] sm:$0xff]  ;;  %v506_v39 = vld [vmem:[#allocation5 + $0x148] sm:$0xff] }
  0x72   :  { %v486_v22 = vsub.f32 %v965_v46, %v977_v57  ;;  %v995_v23 = vadd.f32 %v479_v15, %v413_v38  ;;  %v997_v49 = vadd.f32 %v480_v52, %v414_v51  ;;  %v999_v6 = vadd.f32 %v481_v1, %v415_v59  ;;  %v505_v38 = vld [vmem:[#allocation5 + $0x140] sm:$0xff]  ;;  %v507_v40 = vld [vmem:[#allocation5 + $0x150] sm:$0xff]  ;;  %v508_v46 = vld [vmem:[#allocation5 + $0x158] sm:$0xff] }
  0x73   :  { %v1001_v47 = vadd.f32 %v482_v18, %v416_v31  ;;  %v513_v17 = vmax.f32 %v496_v2, 0.0  ;;  %v514_v24 = vmax.f32 %v497_v3, 0.0  ;;  %v515_v60 = vmax.f32 %v498_v4, 0.0  ;;  %v509_v59 = vld [vmem:[#allocation5 + $0x160] sm:$0xff]  ;;  %v510_v8 = vld [vmem:[#allocation5 + $0x168] sm:$0xff]  ;;  %v511_v13 = vld [vmem:[#allocation5 + $0x170] sm:$0xff] }
  0x74   :  { %v516_v12 = vmax.f32 %v499_v43, 0.0  ;;  %v517_v53 = vmax.f32 %v500_v21, 0.0  ;;  %v518_v25 = vmax.f32 %v501_v45, 0.0  ;;  %v519_v26 = vmax.f32 %v502_v50, 0.0  ;;  %v512_v14 = vld [vmem:[#allocation5 + $0x178] sm:$0xff] }
  0x75   :  { %v520_v27 = vmax.f32 %v503_v5, 0.0  ;;  %v521_v28 = vmin.f32 %v513_v17, 255.0  ;;  %v522_v29 = vmin.f32 %v514_v24, 255.0  ;;  %v523_v61 = vmin.f32 %v515_v60, 255.0 }
  0x76   :  { %v524_v30 = vmin.f32 %v516_v12, 255.0  ;;  %v525_v34 = vmin.f32 %v517_v53, 255.0  ;;  %v526_v37 = vmin.f32 %v518_v25, 255.0  ;;  %v527_v41 = vmin.f32 %v519_v26, 255.0 }
  0x77   :  { %v528_v51 = vmin.f32 %v520_v27, 255.0  ;;  %v669_v55 = vround.rtne.f32 %v521_v28  ;;  %v670_v7 = vround.rtne.f32 %v522_v29  ;;  %v671_v9 = vround.rtne.f32 %v523_v61 }
  0x78   :  { %v672_v10 = vround.rtne.f32 %v524_v30  ;;  %v673_v31 = vround.rtne.f32 %v525_v34  ;;  %v674_v42 = vround.rtne.f32 %v526_v37  ;;  %v675_v32 = vround.rtne.f32 %v527_v41 }
  0x79   :  { %v676_v57 = vround.rtne.f32 %v528_v51  ;;  %v537_v15 = vmul.f32 0.00038394608, %v669_v55  ;;  %v538_v52 = vmul.f32 0.00038394608, %v670_v7  ;;  %v491_v1 = vadd.f32 %v483_v16, %v417_v54 }
  0x7a   :  { %v539_v18 = vmul.f32 0.00038394608, %v671_v9  ;;  %v540_v2 = vmul.f32 0.00038394608, %v672_v10  ;;  %v541_v3 = vmul.f32 0.00038394608, %v673_v31  ;;  %v492_v4 = vadd.f32 %v484_v19, %v418_v62 }
  0x7b   :  { %v542_v43 = vmul.f32 0.00038394608, %v674_v42  ;;  %v543_v21 = vmul.f32 0.00038394608, %v675_v32  ;;  %v544_v45 = vmul.f32 0.00038394608, %v676_v57  ;;  %v493_v50 = vadd.f32 %v485_v58, %v419_v20 }
  0x7c   :  { %v545_v5 = vmul.f32 0.00038394608, %v505_v38  ;;  %v546_v17 = vmul.f32 0.00038394608, %v506_v39  ;;  %v547_v24 = vmul.f32 0.00038394608, %v507_v40  ;;  %v494_v60 = vadd.f32 %v486_v22, %v420_v11 }
  0x7d   :  { %v548_v12 = vmul.f32 0.00038394608, %v508_v46  ;;  %v549_v53 = vmul.f32 0.00038394608, %v509_v59  ;;  %v550_v25 = vmul.f32 0.00038394608, %v510_v8 }
  0x7e   :  { %v551_v26 = vmul.f32 0.00038394608, %v511_v13  ;;  %v552_v27 = vmul.f32 0.00038394608, %v512_v14  ;;  %v553_v28 = vsub.f32 %v537_v15, %v545_v5  ;;  %v554_v29 = vsub.f32 %v538_v52, %v546_v17 }
  0x7f   :  { %v555_v54 = vsub.f32 %v539_v18, %v547_v24  ;;  %v556_v16 = vsub.f32 %v540_v2, %v548_v12  ;;  %v557_v61 = vsub.f32 %v541_v3, %v549_v53  ;;  %v558_v30 = vsub.f32 %v542_v43, %v550_v25 }
  0x80   :  { %v559_v62 = vsub.f32 %v543_v21, %v551_v26  ;;  %v560_v19 = vsub.f32 %v544_v45, %v552_v27  ;;  %v561_v34 = vadd.f32 %v553_v28, %v995_v23  ;;  %v562_v20 = vadd.f32 %v554_v29, %v997_v49 }
  0x81   :  { %v563_v58 = vadd.f32 %v555_v54, %v999_v6  ;;  %v564_v11 = vadd.f32 %v556_v16, %v1001_v47  ;;  %v565_v22 = vadd.f32 %v557_v61, %v491_v1  ;;  %v566_v37 = vadd.f32 %v558_v30, %v492_v4 }
  0x82   :  { %v567_v38 = vadd.f32 %v559_v62, %v493_v50  ;;  %v568_v39 = vadd.f32 %v560_v19, %v494_v60  ;;  %v569_v40 = vmul.f32 %v561_v34, %v561_v34  ;;  %v570_v41 = vmul.f32 %v562_v20, %v562_v20 }
  0x83   :  { %v571_v51 = vmul.f32 %v563_v58, %v563_v58  ;;  %v572_v55 = vmul.f32 %v564_v11, %v564_v11  ;;  %v573_v7 = vmul.f32 %v565_v22, %v565_v22  ;;  %v574_v46 = vmul.f32 %v566_v37, %v566_v37 }
  0x84   :  { %v575_v59 = vmul.f32 %v567_v38, %v567_v38  ;;  %v576_v8 = vmul.f32 %v568_v39, %v568_v39  ;;  %v577_v23 = vsel %vm80_vm0, %v569_v40, 0.0  ;;  %v578_v49 = vsel %vm80_vm0, %v570_v41, 0.0 }
  0x85   :  { %v585_v6 = vmul.f32 %v894_v33, %v577_v23  ;;  %v586_v47 = vmul.f32 %v897_v36, %v578_v49  ;;  %v587_v9 = vmul.f32 %v894_v33, %v571_v51  ;;  %v588_v10 = vmul.f32 %v897_v36, %v572_v55 }
  0x86   :  { %v583_v31 = vsel %vm87_vm3, %v575_v59, 0.0  ;;  %v584_v42 = vsel %vm87_vm3, %v576_v8, 0.0  ;;  %v589_v13 = vmul.f32 %v894_v33, %v573_v7  ;;  %v590_v14 = vmul.f32 %v897_v36, %v574_v46 }
  0x87   :  { %v591_v35 = vmul.f32 %v894_v33, %v583_v31  ;;  %v592_v32 = vmul.f32 %v897_v36, %v584_v42  ;;  %v593_v57 = vadd.f32 %v587_v9, %v585_v6  ;;  %v594_v15 = vadd.f32 %v588_v10, %v586_v47 }
  0x88   :  { %v353_v52 = vadd.f32 %v935_v56, %v919_v0  ;;  %v354_v1 = vadd.f32 %v943_v63, %v927_v44 }
  0x89   :  { %v595_v18 = vadd.f32 %v591_v35, %v589_v13  ;;  %v596_v2 = vadd.f32 %v592_v32, %v590_v14 }
  0x8b   :  { %v597_v48 = vadd.f32 %v595_v18, %v593_v57  ;;  %v598_v3 = vadd.f32 %v596_v2, %v594_v15 }
  0x8d   :  { %v599_v4 = vadd.f32 %v597_v48, %v353_v52  ;;  %v600_v43 = vadd.f32 %v598_v3, %v354_v1 }
  0x8f   :  { %605 = vst [vmem:[#allocation7] sm:$0xff] %v599_v4  ;;  %606 = vst [vmem:[#allocation7 + $0x8] sm:$0xff] %v600_v43 }
  0x90   :  { %738 = shalt.err (!%p735_p6)
}
  0x91   :  { %s739_s10 = scalar_lea.hbm %s1041_s2, 256 }
  0x92   :  { %p740_p7 = scmp.ne.s32.totalorder %s1041_s2, %s739_s10  ;;  %p743_p8 = scmp.lt.u32.totalorder %s739_s10, %s1041_s2 }
  0x94   :  { %p745_p9 = pnand %p743_p8, %p740_p7 }
  0x96   :  { %748 = shalt.err (!%p745_p9)
}
  0x97   :  { %616 = dma.vmem_to_hbm [thread:$0]  %s614_s6, 256, %s1041_s2, [#allocation4]  }
  0x98   :  { %753 = dma.done.wait [#allocation4], 256  }
  0x99   :  { %754 = vsyncadd [#allocation4], 4294967040 }
  0x9a   :  { %620 = vsyncpa [#allocation3], 1 }
  0x9b   :  { %621 = vsyncpa [#allocation6], 1 }
  0x9c   :  { %622 = vsyncpa [#allocation4], 1 }

</bundles_post_ra>
